<compile_context>
chip_gen: v7x
topology: tpu7x:2x2x1
jax: 0.10.0
libtpu: 0.0.40
codegen_flags: <defaults>
</compile_context>

<pallas_src>
import jax
import jax.numpy as jnp
from jax.experimental import pallas as pl
from jax.experimental.pallas import tpu as pltpu

N_EMBD = 30
HIDDEN = 4 * N_EMBD  # 120


def _round_up(a, b):
    return (a + b - 1) // b * b


def ffn_kernel(x_ref, w1_ref, b1_ref, w2_ref, b2_ref, o_ref):
    # x_ref : (TM, 30)  f32  activation tile (rows of x)
    # w1_ref: (120, 30) f32  linear1 weight, torch (out, in)
    # b1_ref: (120, 1)  f32
    # w2_ref: (30, 120) f32  linear2 weight, torch (out, in)
    # b2_ref: (30, 1)   f32
    # o_ref : (30, TM)  f32  lane-dense output tile (M on lanes)
    x = x_ref[...]
    # h[o, m] = sum_c w1[o, c] * x[m, c]  -> (120, TM), M lane-dense (trans-B)
    h = jax.lax.dot_general(
        w1_ref[...], x, (((1,), (1,)), ((), ())),
        preferred_element_type=jnp.float32)
    h = jnp.maximum(h + b1_ref[...], 0.0)          # bias + ReLU, (120,1) lane-bcast
    # y[c, m] = sum_o w2[c, o] * h[o, m]  -> (30, TM), plain NN matmul
    y = jnp.dot(w2_ref[...], h, preferred_element_type=jnp.float32)
    o_ref[...] = (y + b2_ref[...]).astype(o_ref.dtype)   # unmasked lane-dense vst


def feed_forward(x, w1, b1, w2, b2, *, tile_m=8192):
    """x: (..., n_embd) float32. Returns same shape (eval-mode FFN)."""
    orig_shape = x.shape
    m = 1
    for d in orig_shape[:-1]:
        m *= d
    x2d = x.reshape(m, N_EMBD)

    # Lane tile: multiple of 128 (required by the lane-dense (30, TM) out
    # block); aim for >= 2 tiles so both v7x TensorCores get work; cap for VMEM.
    tm = max(128, min(tile_m, _round_up(pl.cdiv(m, 2), 128)))
    grid = pl.cdiv(m, tm)   # ragged last block handled by Pallas masking

    out_t = pl.pallas_call(
        ffn_kernel,
        out_shape=jax.ShapeDtypeStruct((N_EMBD, m), x.dtype),
        grid_spec=pl.GridSpec(
            grid=(grid,),
            in_specs=[
                pl.BlockSpec((tm, N_EMBD), lambda i: (i, 0)),        # x tile
                pl.BlockSpec((HIDDEN, N_EMBD), lambda i: (0, 0)),    # w1 (resident)
                pl.BlockSpec((HIDDEN, 1), lambda i: (0, 0)),         # b1 (resident)
                pl.BlockSpec((N_EMBD, HIDDEN), lambda i: (0, 0)),    # w2 (resident)
                pl.BlockSpec((N_EMBD, 1), lambda i: (0, 0)),         # b2 (resident)
            ],
            out_specs=pl.BlockSpec((N_EMBD, tm), lambda i: (0, i)),  # lane-dense
        ),
        compiler_params=pltpu.CompilerParams(
            dimension_semantics=("parallel",),        # shard M tiles across TCs
            vmem_limit_bytes=32 * 1024 * 1024,
        ),
    )(x2d, w1, b1, w2, b2)

    # (30, m) -> (m, 30) -> original shape; layout plumbing only.
    return out_t.T.reshape(orig_shape)


def init_params(key):
    """PyTorch-style init U(-1/sqrt(fan_in), 1/sqrt(fan_in)); torch (out,in) layout."""
    k1, k2, k3, k4 = jax.random.split(key, 4)
    bound1 = 1.0 / (N_EMBD ** 0.5)
    bound2 = 1.0 / (HIDDEN ** 0.5)
    w1 = jax.random.uniform(k1, (HIDDEN, N_EMBD), jnp.float32, -bound1, bound1)
    b1 = jax.random.uniform(k2, (HIDDEN, 1), jnp.float32, -bound1, bound1)
    w2 = jax.random.uniform(k3, (N_EMBD, HIDDEN), jnp.float32, -bound2, bound2)
    b2 = jax.random.uniform(k4, (N_EMBD, 1), jnp.float32, -bound2, bound2)
    return w1, b1, w2, b2


def _reference(x, w1, b1, w2, b2):
    # pure-JAX f32 reference (eval-mode dropout == identity), full-precision dots
    with jax.default_matmul_precision("highest"):
        h = jnp.maximum(x @ w1.T + b1[:, 0], 0.0)
        return h @ w2.T + b2[:, 0]


if __name__ == "__main__":
    key = jax.random.PRNGKey(0)
    kx, kx2, kp = jax.random.split(key, 3)

    w1, b1, w2, b2 = init_params(kp)

    # Case 1: batch=2, seq=8  (m = 16, single lane tile)
    x = jax.random.normal(kx, (2, 8, N_EMBD), jnp.float32)
    out = jax.block_until_ready(feed_forward(x, w1, b1, w2, b2))
    ref = _reference(x, w1, b1, w2, b2)
    assert out.shape == x.shape
    # f32 matmuls -> near-exact parity; tolerance leaves margin for MXU
    # accumulation-order differences.
    assert jnp.allclose(out, ref, atol=1e-4, rtol=1e-4), "mismatch vs reference (case 1)"

    # Case 2: m = 21 (not a multiple of 8/128) -> exercises the ragged masked block
    x2 = jax.random.normal(kx2, (3, 7, N_EMBD), jnp.float32)
    out2 = jax.block_until_ready(feed_forward(x2, w1, b1, w2, b2))
    ref2 = _reference(x2, w1, b1, w2, b2)
    assert out2.shape == x2.shape
    assert jnp.allclose(out2, ref2, atol=1e-4, rtol=1e-4), "mismatch vs reference (case 2)"

    print("KERNEL_OK")
</pallas_src>

<mosaic_0001>
module attributes {stable_mosaic.version = 11 : i64} {
  func.func @ffn_kernel(%arg0: i32, %arg1: memref<128x30xf32, #tpu.memory_space<vmem>>, %arg2: memref<120x30xf32, #tpu.memory_space<vmem>>, %arg3: memref<120x1xf32, #tpu.memory_space<vmem>>, %arg4: memref<30x120xf32, #tpu.memory_space<vmem>>, %arg5: memref<30x1xf32, #tpu.memory_space<vmem>>, %arg6: memref<30x128xf32, #tpu.memory_space<vmem>>) attributes {dimension_semantics = [#tpu.dimension_semantics<parallel>], iteration_bounds = array<i64: 1>, scalar_prefetch = 0 : i64, scratch_operands = 0 : i64, tpu.core_type = #tpu.core_type<tc>, window_params = [{transform_indices = @transform_0, window_bounds = array<i64: 128, 30>}, {pipeline_mode = #tpu.pipeline_mode<synchronous>, transform_indices = @transform_1, window_bounds = array<i64: 120, 30>}, {pipeline_mode = #tpu.pipeline_mode<synchronous>, transform_indices = @transform_2, window_bounds = array<i64: 120, 1>}, {pipeline_mode = #tpu.pipeline_mode<synchronous>, transform_indices = @transform_3, window_bounds = array<i64: 30, 120>}, {pipeline_mode = #tpu.pipeline_mode<synchronous>, transform_indices = @transform_4, window_bounds = array<i64: 30, 1>}, {transform_indices = @transform_5, window_bounds = array<i64: 30, 128>}]} {
    %c0 = arith.constant 0 : index
    %c0_0 = arith.constant 0 : index
    %0 = vector.load %arg1[%c0, %c0_0] : memref<128x30xf32, #tpu.memory_space<vmem>>, vector<128x30xf32>
    %c0_1 = arith.constant 0 : index
    %c0_2 = arith.constant 0 : index
    %1 = vector.load %arg2[%c0_1, %c0_2] : memref<120x30xf32, #tpu.memory_space<vmem>>, vector<120x30xf32>
    %cst = arith.constant dense<0.000000e+00> : vector<120x128xf32>
    %2 = tpu.matmul %1, %0, %cst {dimension_numbers = #tpu.dot_dimension_numbers<[1], [1], [0], [0], [0, 0, 1, 0], [], []>} : vector<120x30xf32>, vector<128x30xf32>, vector<120x128xf32> -> vector<120x128xf32>
    %c0_3 = arith.constant 0 : index
    %c0_4 = arith.constant 0 : index
    %3 = vector.load %arg3[%c0_3, %c0_4] : memref<120x1xf32, #tpu.memory_space<vmem>>, vector<120x1xf32>
    %4 = vector.broadcast %3 : vector<120x1xf32> to vector<120x128xf32>
    %5 = arith.addf %2, %4 : vector<120x128xf32>
    %cst_5 = arith.constant 0.000000e+00 : f32
    %6 = vector.broadcast %cst_5 : f32 to vector<120x128xf32>
    %7 = arith.maximumf %5, %6 : vector<120x128xf32>
    %c0_6 = arith.constant 0 : index
    %c0_7 = arith.constant 0 : index
    %8 = vector.load %arg4[%c0_6, %c0_7] : memref<30x120xf32, #tpu.memory_space<vmem>>, vector<30x120xf32>
    %cst_8 = arith.constant dense<0.000000e+00> : vector<30x128xf32>
    %9 = tpu.matmul %8, %7, %cst_8 {dimension_numbers = #tpu.dot_dimension_numbers<[1], [0], [0], [1], [0, 0, 1, 1], [], []>} : vector<30x120xf32>, vector<120x128xf32>, vector<30x128xf32> -> vector<30x128xf32>
    %c0_9 = arith.constant 0 : index
    %c0_10 = arith.constant 0 : index
    %10 = vector.load %arg5[%c0_9, %c0_10] : memref<30x1xf32, #tpu.memory_space<vmem>>, vector<30x1xf32>
    %11 = vector.broadcast %10 : vector<30x1xf32> to vector<30x128xf32>
    %12 = arith.addf %9, %11 : vector<30x128xf32>
    %c0_11 = arith.constant 0 : index
    %c0_12 = arith.constant 0 : index
    %13 = vector.load %arg6[%c0_11, %c0_12] : memref<30x128xf32, #tpu.memory_space<vmem>>, vector<30x128xf32>
    tpu.vector_store %arg6[%c0_11, %c0_12], %12 {strides = array<i32>} : memref<30x128xf32, #tpu.memory_space<vmem>>, vector<30x128xf32>,
    return
  }
  func.func @transform_0(%arg0: i32) -> (i32, i32) {
    %c0_i32 = arith.constant 0 : i32
    %c0_i32_0 = arith.constant 0 : i32
    return %arg0, %c0_i32 : i32, i32
  }
  func.func @transform_1(%arg0: i32) -> (i32, i32) {
    %c0_i32 = arith.constant 0 : i32
    %c0_i32_0 = arith.constant 0 : i32
    %c0_i32_1 = arith.constant 0 : i32
    return %c0_i32, %c0_i32_0 : i32, i32
  }
  func.func @transform_2(%arg0: i32) -> (i32, i32) {
    %c0_i32 = arith.constant 0 : i32
    %c0_i32_0 = arith.constant 0 : i32
    %c0_i32_1 = arith.constant 0 : i32
    return %c0_i32, %c0_i32_0 : i32, i32
  }
  func.func @transform_3(%arg0: i32) -> (i32, i32) {
    %c0_i32 = arith.constant 0 : i32
    %c0_i32_0 = arith.constant 0 : i32
    %c0_i32_1 = arith.constant 0 : i32
    return %c0_i32, %c0_i32_0 : i32, i32
  }
  func.func @transform_4(%arg0: i32) -> (i32, i32) {
    %c0_i32 = arith.constant 0 : i32
    %c0_i32_0 = arith.constant 0 : i32
    %c0_i32_1 = arith.constant 0 : i32
    return %c0_i32, %c0_i32_0 : i32, i32
  }
  func.func @transform_5(%arg0: i32) -> (i32, i32) {
    %c0_i32 = arith.constant 0 : i32
    %c0_i32_0 = arith.constant 0 : i32
    return %c0_i32, %arg0 : i32, i32
  }
}

</mosaic_0001>

<bundles_post_ra>
// kernel: tpu_custom_call.1
= control target key start
LH: loop header
LB: loop body
LE: loop exit
PB: predicated region body
PF: predicated region fallthrough
CT: control target
= control target key end

     0   :  { %vm141_vm0 = vcmask 244736   ;;  %v788_v0 = vmov 0.0|0.0   ;;  %vm789_vm2 = vmmov 0   ;;  %v790_v4 = vmov 0.0   ;;  %s1075_s0 = inlined_call_operand.vmem [shape: f32[16,30], index: 0, kind: input, shape index: {}]   ;;  %s1076_s2 = inlined_call_operand.vmem [shape: f32[120,1], index: 2, kind: input, shape index: {}]   ;;  %s1077_s4 = inlined_call_operand.vmem [shape: f32[30,1], index: 4, kind: input, shape index: {}]   ;;  %s1078_s1 = inlined_call_operand.vmem [shape: f32[120,30], index: 1, kind: input, shape index: {}]   ;;  %s1079_s3 = inlined_call_operand.vmem [shape: f32[30,120], index: 3, kind: input, shape index: {}]   ;;  %s1080_s5 = inlined_call_operand.vmem [shape: f32[30,16], index: 5, kind: output, shape index: {}]  }
   0x1   :  { %722 = vmatprep.subr.bf16.mxu0 %v788_v0  ;;  %v20_v1 = vld [vmem:[%s1075_s0] sm:$0xff]  ;;  %v21_v2 = vld [vmem:[%s1075_s0 + $0x8] sm:$0xff]  ;;  %vm831_vm1 = vmpackc.low %vm141_vm0, %vm141_vm0  ;;  %641 = vmatprep.mubr.msk.f32.mxu0 %vm789_vm2, %v790_v4  ;;  %v791_v6 = vmov 0   ;;  %vm418_vm3 = vcmask 982016  }
   0x2   :  { %v723_v5 = vpack.c.bf16 %v21_v2, %v20_v1  ;;  %786 = vset.pattern.permute.xlu0 %v791_v6  ;;  %787 = vset.pattern.permute.xlu1 %v791_v6  ;;  %v22_v7 = vld [vmem:[%s1075_s0 + $0x10] sm:$0xff]  ;;  %v23_v8 = vld [vmem:[%s1075_s0 + $0x18] sm:$0xff]  ;;  %v51_v10 = vld [vmem:[%s1076_s2] sm:$0xff] }
   0x3   :  { %v727_v9 = vpack.c.bf16 %v23_v8, %v22_v7  ;;  %68 = vperm.xlu0 %786, %v51_v10   ;;  %v53_v11 = vld [vmem:[%s1076_s2 + $0x10] sm:$0xff]  ;;  %v24_v12 = vld [vmem:[%s1075_s0 + $0x20] sm:$0xff]  ;;  %v25_v13 = vld [vmem:[%s1075_s0 + $0x28] sm:$0xff] }
   0x4   :  { %725 = vmatpush3.bf16.xpose.msk.msra.mxu0 %vm831_vm1, %v723_v5  ;;  %v52_v14 = vld [vmem:[%s1076_s2 + $0x8] sm:$0xff]  ;;  %78 = vperm.xlu1 %787, %v53_v11   ;;  %v54_v15 = vld [vmem:[%s1076_s2 + $0x18] sm:$0xff]  ;;  %v731_v16 = vpack.c.bf16 %v25_v13, %v24_v12  ;;  %v55_v17 = vld [vmem:[%s1076_s2 + $0x20] sm:$0xff] }
   0x5   :  { %726 = vmatprep.subr.bf16.mxu0 %v788_v0  ;;  %v56_v18 = vld [vmem:[%s1076_s2 + $0x28] sm:$0xff]  ;;  %v26_v19 = vld [vmem:[%s1075_s0 + $0x30] sm:$0xff]  ;;  %v27_v20 = vld [vmem:[%s1075_s0 + $0x38] sm:$0xff] }
   0x6   :  { %v57_v21 = vld [vmem:[%s1076_s2 + $0x30] sm:$0xff]  ;;  %v58_v22 = vld [vmem:[%s1076_s2 + $0x38] sm:$0xff]  ;;  %v735_v23 = vpack.c.bf16 %v27_v20, %v26_v19  ;;  %v59_v24 = vld [vmem:[%s1076_s2 + $0x40] sm:$0xff] }
   0x7   :  { %73 = vperm.xlu0 %786, %v52_v14   ;;  %v60_v25 = vld [vmem:[%s1076_s2 + $0x48] sm:$0xff]  ;;  %v28_v26 = vld [vmem:[%s1075_s0 + $0x40] sm:$0xff]  ;;  %v61_v28 = vld [vmem:[%s1076_s2 + $0x50] sm:$0xff] }
   0x8   :  { %83 = vperm.xlu1 %787, %v54_v15   ;;  %v29_v27 = vld [vmem:[%s1075_s0 + $0x48] sm:$0xff]  ;;  %v62_v29 = vld [vmem:[%s1076_s2 + $0x58] sm:$0xff]  ;;  %v63_v31 = vld [vmem:[%s1076_s2 + $0x60] sm:$0xff] }
   0x9   :  { %v739_v30 = vpack.c.bf16 %v29_v27, %v28_v26  ;;  %v64_v32 = vld [vmem:[%s1076_s2 + $0x68] sm:$0xff]  ;;  %v30_v33 = vld [vmem:[%s1075_s0 + $0x50] sm:$0xff]  ;;  %v31_v34 = vld [vmem:[%s1075_s0 + $0x58] sm:$0xff] }
   0xa   :  { %v65_v35 = vld [vmem:[%s1076_s2 + $0x70] sm:$0xff]  ;;  %v394_v36 = vld [vmem:[%s1077_s4] sm:$0xff]  ;;  %v743_v37 = vpack.c.bf16 %v31_v34, %v30_v33  ;;  %v395_v38 = vld [vmem:[%s1077_s4 + $0x8] sm:$0xff] }
   0xb   :  { %88 = vperm.xlu0 %786, %v55_v17   ;;  %v396_v39 = vld [vmem:[%s1077_s4 + $0x10] sm:$0xff]  ;;  %v32_v40 = vld [vmem:[%s1075_s0 + $0x60] sm:$0xff]  ;;  %v33_v41 = vld [vmem:[%s1075_s0 + $0x68] sm:$0xff] }
   0xc   :  { %729 = vmatpush3.bf16.xpose.msk.msra.mxu0 %vm831_vm1, %v727_v9  ;;  %93 = vperm.xlu1 %787, %v56_v18   ;;  %v397_v42 = vld [vmem:[%s1077_s4 + $0x18] sm:$0x3f]  ;;  %v747_v43 = vpack.c.bf16 %v33_v41, %v32_v40  ;;  %v34_v44 = vld [vmem:[%s1075_s0 + $0x70] sm:$0xff]  ;;  %v36_v47 = vld [vmem:[%s1078_s1] sm:$0xff] }
   0xd   :  { %730 = vmatprep.subr.bf16.mxu0 %v788_v0  ;;  %v35_v45 = vld [vmem:[%s1075_s0 + $0x78] sm:$0xff]  ;;  %v37_v48 = vld [vmem:[%s1078_s1 + $0x8] sm:$0xff]  ;;  %v38_v49 = vld [vmem:[%s1078_s1 + $0x10] sm:$0xff] }
   0xe   :  { %v751_v46 = vpack.c.bf16 %v35_v45, %v34_v44  ;;  %v39_v50 = vld [vmem:[%s1078_s1 + $0x18] sm:$0xff]  ;;  %v40_v51 = vld [vmem:[%s1078_s1 + $0x20] sm:$0xff]  ;;  %v41_v52 = vld [vmem:[%s1078_s1 + $0x28] sm:$0xff] }
   0xf   :  { %98 = vperm.xlu0 %786, %v57_v21   ;;  %v42_v53 = vld [vmem:[%s1078_s1 + $0x30] sm:$0xff]  ;;  %v43_v54 = vld [vmem:[%s1078_s1 + $0x38] sm:$0xff]  ;;  %v44_v55 = vld [vmem:[%s1078_s1 + $0x40] sm:$0xff] }
  0x10   :  { %103 = vperm.xlu1 %787, %v58_v22   ;;  %v45_v56 = vld [vmem:[%s1078_s1 + $0x48] sm:$0xff]  ;;  %v46_v57 = vld [vmem:[%s1078_s1 + $0x50] sm:$0xff]  ;;  %v47_v58 = vld [vmem:[%s1078_s1 + $0x58] sm:$0xff] }
  0x11   :  { %v48_v59 = vld [vmem:[%s1078_s1 + $0x60] sm:$0xff]  ;;  %v49_v60 = vld [vmem:[%s1078_s1 + $0x68] sm:$0xff]  ;;  %v50_v61 = vld [vmem:[%s1078_s1 + $0x70] sm:$0xff] }
  0x12   :  { %v390_v62 = vld [vmem:[%s1079_s3] sm:$0xff] }
  0x13   :  { %108 = vperm.xlu0 %786, %v59_v24   ;;  %716 = vmatprep.mubr.msk.f32.mxu1 %vm418_vm3, %v390_v62 }
  0x14   :  { %733 = vmatpush3.bf16.xpose.msk.msra.mxu0 %vm831_vm1, %v731_v16  ;;  %113 = vperm.xlu1 %787, %v60_v25  }
  0x15   :  { %734 = vmatprep.subr.bf16.mxu0 %v788_v0 }
  0x17   :  { %118 = vperm.xlu0 %786, %v61_v28  }
  0x18   :  { %123 = vperm.xlu1 %787, %v62_v29  }
  0x1b   :  { %128 = vperm.xlu0 %786, %v63_v31  }
  0x1c   :  { %737 = vmatpush3.bf16.xpose.msk.msra.mxu0 %vm831_vm1, %v735_v23  ;;  %133 = vperm.xlu1 %787, %v64_v32  }
  0x1d   :  { %738 = vmatprep.subr.bf16.mxu0 %v788_v0 }
  0x1f   :  { %138 = vperm.xlu0 %786, %v65_v35  }
  0x20   :  { %400 = vperm.xlu1 %787, %v394_v36  }
  0x23   :  { %405 = vperm.xlu0 %786, %v395_v38  }
  0x24   :  { %741 = vmatpush3.bf16.xpose.msk.msra.mxu0 %vm831_vm1, %v739_v30  ;;  %410 = vperm.xlu1 %787, %v396_v39  }
  0x25   :  { %742 = vmatprep.subr.bf16.mxu0 %v788_v0 }
  0x27   :  { %415 = vperm.xlu0 %786, %v397_v42  }
  0x2c   :  { %745 = vmatpush3.bf16.xpose.msk.msra.mxu0 %vm831_vm1, %v743_v37 }
  0x2d   :  { %746 = vmatprep.subr.bf16.mxu0 %v788_v0 }
  0x34   :  { %749 = vmatpush3.bf16.xpose.msk.msra.mxu0 %vm831_vm1, %v747_v43 }
  0x35   :  { %750 = vmatprep.subr.bf16.mxu0 %v788_v0 }
  0x3c   :  { %753 = vmatpush3.bf16.xpose.msk.msra.mxu0 %vm831_vm1, %v751_v46 }
  0x43   :  { %642 = vmatmul.mubr.msk.f32.vlgmr.msra.gmra.mrb[0].mxu0 %vm141_vm0, %v36_v47 }
  0x44   :  { %644 = vmatprep.mubr.msk.f32.mxu0 %vm789_vm2, %v790_v4 }
  0x47   :  { %645 = vmatmul.mubr.msk.f32.gmra.mrb[2].mxu0 %vm141_vm0, %v37_v48 }
  0x48   :  { %647 = vmatprep.mubr.msk.f32.mxu0 %vm789_vm2, %v790_v4 }
  0x4b   :  { %648 = vmatmul.mubr.msk.f32.gmra.mrb[4].mxu0 %vm141_vm0, %v38_v49 }
  0x4c   :  { %650 = vmatprep.mubr.msk.f32.mxu0 %vm789_vm2, %v790_v4 }
  0x4f   :  { %651 = vmatmul.mubr.msk.f32.gmra.mrb[6].mxu0 %vm141_vm0, %v39_v50 }
  0x50   :  { %653 = vmatprep.mubr.msk.f32.mxu0 %vm789_vm2, %v790_v4 }
  0x53   :  { %654 = vmatmul.mubr.msk.f32.gmra.mrb[8].mxu0 %vm141_vm0, %v40_v51 }
  0x54   :  { %656 = vmatprep.mubr.msk.f32.mxu0 %vm789_vm2, %v790_v4 }
  0x57   :  { %657 = vmatmul.mubr.msk.f32.gmra.mrb[10].mxu0 %vm141_vm0, %v41_v52 }
  0x58   :  { %659 = vmatprep.mubr.msk.f32.mxu0 %vm789_vm2, %v790_v4 }
  0x5b   :  { %660 = vmatmul.mubr.msk.f32.gmra.mrb[12].mxu0 %vm141_vm0, %v42_v53 }
  0x5c   :  { %662 = vmatprep.mubr.msk.f32.mxu0 %vm789_vm2, %v790_v4 }
  0x5f   :  { %663 = vmatmul.mubr.msk.f32.gmra.mrb[14].mxu0 %vm141_vm0, %v43_v54 }
  0x60   :  { %665 = vmatprep.mubr.msk.f32.mxu0 %vm789_vm2, %v790_v4 }
  0x63   :  { %666 = vmatmul.mubr.msk.f32.gmra.mrb[16].mxu0 %vm141_vm0, %v44_v55 }
  0x64   :  { %668 = vmatprep.mubr.msk.f32.mxu0 %vm789_vm2, %v790_v4 }
  0x67   :  { %669 = vmatmul.mubr.msk.f32.gmra.mrb[18].mxu0 %vm141_vm0, %v45_v56 }
  0x68   :  { %671 = vmatprep.mubr.msk.f32.mxu0 %vm789_vm2, %v790_v4 }
  0x6b   :  { %672 = vmatmul.mubr.msk.f32.gmra.mrb[20].mxu0 %vm141_vm0, %v46_v57 }
  0x6c   :  { %674 = vmatprep.mubr.msk.f32.mxu0 %vm789_vm2, %v790_v4 }
  0x6f   :  { %675 = vmatmul.mubr.msk.f32.gmra.mrb[22].mxu0 %vm141_vm0, %v47_v58 }
  0x70   :  { %677 = vmatprep.mubr.msk.f32.mxu0 %vm789_vm2, %v790_v4 }
  0x73   :  { %678 = vmatmul.mubr.msk.f32.gmra.mrb[24].mxu0 %vm141_vm0, %v48_v59 }
  0x74   :  { %680 = vmatprep.mubr.msk.f32.mxu0 %vm789_vm2, %v790_v4 }
  0x77   :  { %681 = vmatmul.mubr.msk.f32.gmra.mrb[26].mxu0 %vm141_vm0, %v49_v60 }
  0x78   :  { %683 = vmatprep.mubr.msk.f32.mxu0 %vm789_vm2, %v790_v4 }
  0x7b   :  { %684 = vmatmul.mubr.msk.f32.gmra.mrb[28].mxu0 %vm141_vm0, %v50_v61 }
  0x82   :  { %v69_v63 = vpop.permute.xlu0 %68 }
  0x83   :  { %v79_v7 = vpop.permute.xlu1 %78 }
  0x86   :  { %v74_v3 = vpop.permute.xlu0 %73 }
  0x87   :  { %v84_v14 = vpop.permute.xlu1 %83 }
  0x8a   :  { %v89_v23 = vpop.permute.xlu0 %88 }
  0x8b   :  { %v94_v25 = vpop.permute.xlu1 %93 }
  0x8e   :  { %v99_v34 = vpop.permute.xlu0 %98 }
  0x8f   :  { %v104_v36 = vpop.permute.xlu1 %103 }
  0x92   :  { %v109_v45 = vpop.permute.xlu0 %108 }
  0x93   :  { %v114_v47 = vpop.permute.xlu1 %113 }
  0x96   :  { %v119_v56 = vpop.permute.xlu0 %118 }
  0x97   :  { %v124_v58 = vpop.permute.xlu1 %123 }
 0x116   :  { %v301_v0 = vpop.f32.mrb[0].mxu0 }
 0x117   :  { %v643_v1 = vpop.f32.mrb[1].mxu0  ;;  %v302_v2 = vadd.f32 %v301_v0, %v69_v63 }
 0x119   :  { %v375_v8 = vmax.f32 %v302_v2, 0.0 }
 0x11a   :  { %v306_v5 = vpop.f32.mrb[2].mxu0 }
 0x11b   :  { %v307_v4 = vadd.f32 %v306_v5, %v74_v3  ;;  %v646_v6 = vpop.f32.mrb[3].mxu0  ;;  %v129_v3 = vpop.permute.xlu0 %128 }
 0x11d   :  { %v376_v9 = vmax.f32 %v307_v4, 0.0  ;;  %v134_v4 = vpop.permute.xlu1 %133 }
 0x11e   :  { %v311_v10 = vpop.f32.mrb[4].mxu0 }
 0x11f   :  { %v649_v11 = vpop.f32.mrb[5].mxu0  ;;  %v754_v12 = vpack.c.bf16 %v376_v9, %v375_v8  ;;  %v312_v13 = vadd.f32 %v311_v10, %v79_v7 }
 0x120   :  { %v139_v11 = vpop.permute.xlu0 %138 }
 0x121   :  { %755 = vmatprep.subr.bf16.mxu1 %v754_v12  ;;  %v377_v18 = vmax.f32 %v312_v13, 0.0 }
 0x122   :  { %v316_v15 = vpop.f32.mrb[6].mxu0  ;;  %757 = vmatpush3.bf16.msra.mxu1 %v754_v12 }
 0x123   :  { %v317_v16 = vadd.f32 %v316_v15, %v84_v14  ;;  %v652_v17 = vpop.f32.mrb[7].mxu0 }
 0x124   :  { %v391_v17 = vld [vmem:[%s1079_s3 + $0x8] sm:$0xff] }
 0x125   :  { %v378_v19 = vmax.f32 %v317_v16, 0.0 }
 0x126   :  { %v321_v20 = vpop.f32.mrb[8].mxu0 }
 0x127   :  { %v758_v21 = vpack.c.bf16 %v378_v19, %v377_v18  ;;  %v655_v22 = vpop.f32.mrb[9].mxu0  ;;  %v322_v24 = vadd.f32 %v321_v20, %v89_v23  ;;  %v392_v18 = vld [vmem:[%s1079_s3 + $0x10] sm:$0xff]  ;;  %v393_v19 = vld [vmem:[%s1079_s3 + $0x18] sm:$0x3f]  ;;  %v406_v20 = vpop.permute.xlu0 %405 }
 0x129   :  { %759 = vmatprep.subr.bf16.mxu1 %v758_v21  ;;  %v379_v29 = vmax.f32 %v322_v24, 0.0 }
 0x12a   :  { %v326_v26 = vpop.f32.mrb[10].mxu0  ;;  %761 = vmatpush3.bf16.msra.mxu1 %v758_v21  ;;  %v401_v21 = vpop.permute.xlu1 %400 }
 0x12b   :  { %v327_v27 = vadd.f32 %v326_v26, %v94_v25  ;;  %v658_v28 = vpop.f32.mrb[11].mxu0  ;;  %v416_v26 = vpop.permute.xlu0 %415 }
 0x12d   :  { %v380_v30 = vmax.f32 %v327_v27, 0.0 }
 0x12e   :  { %v331_v31 = vpop.f32.mrb[12].mxu0  ;;  %v411_v28 = vpop.permute.xlu1 %410 }
 0x12f   :  { %v762_v32 = vpack.c.bf16 %v380_v30, %v379_v29  ;;  %v661_v33 = vpop.f32.mrb[13].mxu0  ;;  %v332_v35 = vadd.f32 %v331_v31, %v99_v34 }
 0x131   :  { %763 = vmatprep.subr.bf16.mxu1 %v762_v32  ;;  %v381_v40 = vmax.f32 %v332_v35, 0.0 }
 0x132   :  { %v336_v37 = vpop.f32.mrb[14].mxu0  ;;  %765 = vmatpush3.bf16.msra.mxu1 %v762_v32 }
 0x133   :  { %v337_v38 = vadd.f32 %v336_v37, %v104_v36  ;;  %v664_v39 = vpop.f32.mrb[15].mxu0 }
 0x135   :  { %v382_v41 = vmax.f32 %v337_v38, 0.0 }
 0x136   :  { %v341_v42 = vpop.f32.mrb[16].mxu0 }
 0x137   :  { %v766_v43 = vpack.c.bf16 %v382_v41, %v381_v40  ;;  %v667_v44 = vpop.f32.mrb[17].mxu0  ;;  %v342_v46 = vadd.f32 %v341_v42, %v109_v45 }
 0x139   :  { %767 = vmatprep.subr.bf16.mxu1 %v766_v43  ;;  %v383_v51 = vmax.f32 %v342_v46, 0.0 }
 0x13a   :  { %v346_v48 = vpop.f32.mrb[18].mxu0  ;;  %769 = vmatpush3.bf16.msra.mxu1 %v766_v43 }
 0x13b   :  { %v347_v49 = vadd.f32 %v346_v48, %v114_v47  ;;  %v670_v50 = vpop.f32.mrb[19].mxu0 }
 0x13d   :  { %v384_v52 = vmax.f32 %v347_v49, 0.0 }
 0x13e   :  { %v351_v53 = vpop.f32.mrb[20].mxu0 }
 0x13f   :  { %v770_v54 = vpack.c.bf16 %v384_v52, %v383_v51  ;;  %v673_v55 = vpop.f32.mrb[21].mxu0  ;;  %v352_v57 = vadd.f32 %v351_v53, %v119_v56 }
 0x141   :  { %771 = vmatprep.subr.bf16.mxu1 %v770_v54  ;;  %v385_v62 = vmax.f32 %v352_v57, 0.0 }
 0x142   :  { %v356_v59 = vpop.f32.mrb[22].mxu0  ;;  %773 = vmatpush3.bf16.msra.mxu1 %v770_v54 }
 0x143   :  { %v357_v60 = vadd.f32 %v356_v59, %v124_v58  ;;  %v676_v61 = vpop.f32.mrb[23].mxu0 }
 0x145   :  { %v386_v63 = vmax.f32 %v357_v60, 0.0 }
 0x146   :  { %v361_v0 = vpop.f32.mrb[24].mxu0 }
 0x147   :  { %v774_v1 = vpack.c.bf16 %v386_v63, %v385_v62  ;;  %v679_v2 = vpop.f32.mrb[25].mxu0  ;;  %v362_v5 = vadd.f32 %v361_v0, %v129_v3 }
 0x149   :  { %775 = vmatprep.subr.bf16.mxu1 %v774_v1  ;;  %v387_v9 = vmax.f32 %v362_v5, 0.0 }
 0x14a   :  { %v366_v6 = vpop.f32.mrb[26].mxu0  ;;  %777 = vmatpush3.bf16.msra.mxu1 %v774_v1 }
 0x14b   :  { %v367_v7 = vadd.f32 %v366_v6, %v134_v4  ;;  %v682_v8 = vpop.f32.mrb[27].mxu0 }
 0x14d   :  { %v388_v10 = vmax.f32 %v367_v7, 0.0 }
 0x14e   :  { %v371_v12 = vpop.f32.mrb[28].mxu0 }
 0x14f   :  { %v778_v13 = vpack.c.bf16 %v388_v10, %v387_v9  ;;  %v372_v14 = vadd.f32 %v371_v12, %v139_v11  ;;  %v685_v15 = vpop.f32.mrb[29].mxu0 }
 0x151   :  { %v389_v16 = vmax.f32 %v372_v14, 0.0  ;;  %779 = vmatprep.subr.bf16.mxu1 %v778_v13 }
 0x152   :  { %781 = vmatpush3.bf16.msra.mxu1 %v778_v13 }
 0x153   :  { %714 = vmatprep.subr.mxu1 %v389_v16 }
 0x156   :  { %715 = vmatpush3.msra.mxu1 %v389_v16 }
 0x157   :  { %717 = vmatmul.mubr.msk.f32.vlgmr.msra.gmra.mrb[0].mxu1 %vm418_vm3, %v391_v17 }
 0x158   :  { %719 = vmatprep.mubr.msk.f32.mxu1 %vm418_vm3, %v392_v18 }
 0x15b   :  { %720 = vmatmul.mubr.msk.f32.gmra.mrb[2].mxu1 %vm418_vm3, %v393_v19 }
 0x22a   :  { %v718_v22 = vpop.f32.mrb[0].mxu1 }
 0x22b   :  { %v503_v23 = vadd.f32 %v718_v22, %v406_v20  ;;  %v497_v24 = vpop.f32.mrb[1].mxu1 }
 0x22c   :  { %v498_v25 = vadd.f32 %v497_v24, %v401_v21 }
 0x22d   :  { %517 = vst [vmem:[%s1080_s5 + $0x8] sm:$0xff] %v503_v23 }
 0x22e   :  { %516 = vst [vmem:[%s1080_s5] sm:$0xff] %v498_v25  ;;  %v721_v27 = vpop.f32.mrb[2].mxu1 }
 0x22f   :  { %v513_v29 = vadd.f32 %v721_v27, %v416_v26  ;;  %v507_v30 = vpop.f32.mrb[3].mxu1 }
 0x230   :  { %v508_v31 = vadd.f32 %v507_v30, %v411_v28 }
 0x231   :  { %519 = vst [vmem:[%s1080_s5 + $0x18] sm:$0x3f] %v513_v29 }
 0x232   :  { %518 = vst [vmem:[%s1080_s5 + $0x10] sm:$0xff] %v508_v31 }

</bundles_post_ra>
